<compile_context>
chip_gen: v7x
topology: tpu7x:2x2x1
jax: 0.10.0
libtpu: 0.0.40
codegen_flags: <defaults>
</compile_context>

<pallas_src>
import functools

import jax
import jax.numpy as jnp
from jax import lax
from jax.experimental import pallas as pl
from jax.experimental.pallas import tpu as pltpu

GEM_P = 3.0        # nn.Parameter(torch.ones(1) * 3) in GeM
GEM_EPS = 1e-6     # GeM eps
L2_EPS = 1e-12     # F.normalize eps


def _cosplace_kernel(x_ref, wt_ref, b_ref, wfc_ref, bfc_ref, o_ref, acc_ref,
                     *, inv_hw):
    """One (image, HW-tile) step: 1x1-conv+ReLU backbone stand-in, per-pixel
    channel L2Norm, GeM sum-of-cubes accumulation, and (on the last tile of
    each image) the fused GeM-root + Linear + L2Norm head."""
    hw = pl.program_id(1)

    @pl.when(hw == 0)
    def _():
        acc_ref[...] = jnp.zeros_like(acc_ref)

    # --- backbone stand-in (TODO(synk): real ResNet): (Cf,Cin)@(Cin,T) + ReLU ---
    feats = jnp.dot(wt_ref[...], x_ref[...], preferred_element_type=jnp.float32)
    feats = jnp.maximum(feats + b_ref[...], 0.0)                    # (Cf, T)

    # --- fused channel L2Norm + GeM cube (feats^2 reused; rsqrt, no divide) ---
    f2 = feats * feats                                              # (Cf, T)
    ssq = jnp.sum(f2, axis=0, keepdims=True)                        # (1, T)
    inv = lax.rsqrt(jnp.maximum(ssq, L2_EPS * L2_EPS))              # (1, T)
    inv3 = inv * inv * inv                                          # (1, T) cheap
    # max(y, eps)^3 == max(y^3, eps^3) for y >= 0 (post-ReLU), so the GeM clamp
    # is a single maximum applied to the cube -- no extra (Cf, T) pass for y.
    cube = jnp.maximum(f2 * feats * inv3, GEM_EPS ** 3)             # (Cf, T)

    # --- GeM partial sum: fold lane groups with VPU adds only; defer the
    #     128 -> 1 lane (XLU) reduction to the per-image finalize branch. ---
    cf, t = cube.shape
    if t % 128 == 0:
        folded = cube[:, 0:128]
        for g in range(1, t // 128):
            folded = folded + cube[:, g * 128:(g + 1) * 128]
        acc_ref[...] += folded
    else:
        # Full-extent (non-128-divisible) single-tile fallback.
        acc_ref[:, 0:1] += jnp.sum(cube, axis=1, keepdims=True)

    # --- finalize: GeM mean + 1/p root, Linear, final L2Norm (fused head) ---
    @pl.when(hw == pl.num_programs(1) - 1)
    def _():
        s = jnp.sum(acc_ref[...], axis=1, keepdims=True)            # (Cf, 1)
        # s >= HW * eps^3 > 0, so log is safe; explicit exp/log = one EUP pass.
        gem = jnp.exp(jnp.log(s * inv_hw) * (1.0 / GEM_P))          # (Cf, 1)
        # Matvec as broadcast-multiply + sublane reduce: avoids transposing the
        # pooled column, runs once per image (negligible vs the HW loop).
        out = jnp.sum(gem * wfc_ref[...], axis=0, keepdims=True) + bfc_ref[...]
        n2 = jnp.sum(out * out, axis=1, keepdims=True)              # (1, 1)
        # Zero-padded FC columns are exactly zero -> they do not change n2.
        o_ref[0] = out * lax.rsqrt(jnp.maximum(n2, L2_EPS * L2_EPS))


def _pick_hw_tile(hw, cap=1024):
    """Largest multiple-of-128 divisor of hw, capped (fits v7x's 64 MiB VMEM)."""
    t = min(cap, (hw // 128) * 128)
    while t >= 128:
        if hw % t == 0:
            return t
        t -= 128
    # TODO(synk): for large resolutions with no 128-divisible factor a masked
    # tail tile would be preferable to a single full-extent block.
    return hw


def geolocalization_net(x_nchw, w_conv, b_conv, w_fc, b_fc, *, hw_tile=None):
    """x_nchw: (N, Cin, H, W) f32.  w_conv: (Cin, Cfeat), b_conv: (Cfeat,),
    w_fc: (Cfeat, Fout), b_fc: (Fout,).  Returns (N, Fout) f32."""
    N, Cin, H, W = x_nchw.shape
    HW = H * W
    Cfeat = w_conv.shape[1]
    Fout = w_fc.shape[1]

    if hw_tile is None:
        hw_tile = _pick_hw_tile(HW)
    # GeM mean divides by the true HW, so padded/partial tiles are not allowed.
    assert HW % hw_tile == 0, "spatial extent must be divisible by hw_tile"
    assert hw_tile % 128 == 0 or hw_tile == HW, \
        "hw_tile must be a multiple of 128 or the full spatial extent"
    num_hw = HW // hw_tile

    # Native (N, Cin, HW) order: HW on lanes, channels on sublanes.
    x = x_nchw.reshape(N, Cin, HW).astype(jnp.float32)
    wconv_t = jnp.transpose(w_conv).astype(jnp.float32)             # (Cfeat, Cin)
    bconv_col = b_conv.reshape(Cfeat, 1).astype(jnp.float32)

    # Lane-dense head output: pad Fout to a multiple of 128 with zero weights.
    fout_pad = pl.cdiv(Fout, 128) * 128
    w_fc_p = jnp.pad(w_fc.astype(jnp.float32), ((0, 0), (0, fout_pad - Fout)))
    b_fc_p = jnp.pad(b_fc.astype(jnp.float32).reshape(1, Fout),
                     ((0, 0), (0, fout_pad - Fout)))

    kernel = functools.partial(_cosplace_kernel, inv_hw=1.0 / float(HW))

    out = pl.pallas_call(
        kernel,
        out_shape=jax.ShapeDtypeStruct((N, 1, fout_pad), jnp.float32),
        grid_spec=pltpu.PrefetchScalarGridSpec(
            num_scalar_prefetch=0,
            grid=(N, num_hw),
            in_specs=[
                pl.BlockSpec((pl.Squeezed(), Cin, hw_tile),
                             lambda b, h: (b, 0, h)),
                pl.BlockSpec((Cfeat, Cin), lambda b, h: (0, 0)),
                pl.BlockSpec((Cfeat, 1), lambda b, h: (0, 0)),
                pl.BlockSpec((Cfeat, fout_pad), lambda b, h: (0, 0)),
                pl.BlockSpec((1, fout_pad), lambda b, h: (0, 0)),
            ],
            out_specs=pl.BlockSpec((1, 1, fout_pad), lambda b, h: (b, 0, 0)),
            scratch_shapes=[pltpu.VMEM((Cfeat, 128), jnp.float32)],
        ),
        compiler_params=pltpu.CompilerParams(
            dimension_semantics=("parallel", "arbitrary"),
            vmem_limit_bytes=48 * 1024 * 1024),
    )(x, wconv_t, bconv_col, w_fc_p, b_fc_p)

    out = out.reshape(N, fout_pad)
    return out[:, :Fout] if fout_pad != Fout else out


def _reference(x_nchw, w_conv, b_conv, w_fc, b_fc):
    """Pure-JAX reference of the same forward (PyTorch semantics)."""
    N, Cin, H, W = x_nchw.shape
    x = jnp.transpose(x_nchw.reshape(N, Cin, H * W), (0, 2, 1))     # (N, HW, Cin)
    feats = jnp.maximum(jnp.einsum("nsc,cf->nsf", x, w_conv) + b_conv, 0.0)
    norm = jnp.sqrt(jnp.sum(feats * feats, axis=-1, keepdims=True))
    y = feats / jnp.maximum(norm, L2_EPS)
    g = jnp.mean(jnp.maximum(y, GEM_EPS) ** GEM_P, axis=1) ** (1.0 / GEM_P)
    out = g @ w_fc + b_fc
    n2 = jnp.sqrt(jnp.sum(out * out, axis=-1, keepdims=True))
    return out / jnp.maximum(n2, L2_EPS)


if __name__ == "__main__":
    # Small shapes consistent with the forward:
    #   image: N=2, Cin=4, H=W=16; features_dim=64 (scaled-down "512");
    #   fc_output_dim=32.
    N, Cin, H, W = 2, 4, 16, 16
    FEATURES_DIM = 64
    FC_OUTPUT_DIM = 32

    key = jax.random.PRNGKey(0)
    k_x, k_wc, k_bc, k_wf, k_bf = jax.random.split(key, 5)

    x = jax.random.normal(k_x, (N, Cin, H, W), dtype=jnp.float32)

    # Deterministic parameter init (synthetic, no checkpoint loading).
    w_conv = jax.random.normal(k_wc, (Cin, FEATURES_DIM), dtype=jnp.float32) * 0.1
    b_conv = jax.random.normal(k_bc, (FEATURES_DIM,), dtype=jnp.float32) * 0.01
    # nn.Linear(features_dim, fc_output_dim): weight (Fout, Cfeat) stored transposed.
    w_fc = jax.random.normal(k_wf, (FEATURES_DIM, FC_OUTPUT_DIM), dtype=jnp.float32) * 0.1
    b_fc = jax.random.normal(k_bf, (FC_OUTPUT_DIM,), dtype=jnp.float32) * 0.01

    ref = _reference(x, w_conv, b_conv, w_fc, b_fc)

    # hw_tile=128: exercises the multi-tile GeM accumulation path (HW=256 -> 2 steps).
    out_a = jax.block_until_ready(
        geolocalization_net(x, w_conv, b_conv, w_fc, b_fc, hw_tile=128))
    # default hw_tile=256: exercises the intra-tile lane-group fold (2 groups, 1 step).
    out_b = jax.block_until_ready(
        geolocalization_net(x, w_conv, b_conv, w_fc, b_fc))

    assert out_a.shape == (N, FC_OUTPUT_DIM)
    assert out_b.shape == (N, FC_OUTPUT_DIM)
    assert jnp.allclose(out_a, ref, atol=1e-4, rtol=1e-4), "mismatch vs reference (tiled)"
    assert jnp.allclose(out_b, ref, atol=1e-4, rtol=1e-4), "mismatch vs reference (fold)"

    print("KERNEL_OK")
</pallas_src>

<mosaic_0001>
module attributes {stable_mosaic.version = 11 : i64} {
  func.func @_cosplace_kernel(%arg0: i32, %arg1: i32, %arg2: memref<1x4x128xf32, #tpu.memory_space<vmem>>, %arg3: memref<64x4xf32, #tpu.memory_space<vmem>>, %arg4: memref<64x1xf32, #tpu.memory_space<vmem>>, %arg5: memref<64x128xf32, #tpu.memory_space<vmem>>, %arg6: memref<1x128xf32, #tpu.memory_space<vmem>>, %arg7: memref<1x1x128xf32, #tpu.memory_space<vmem>>, %arg8: memref<64x128xf32, #tpu.memory_space<vmem>>) attributes {dimension_semantics = [#tpu.dimension_semantics<parallel>, #tpu.dimension_semantics<arbitrary>], iteration_bounds = array<i64: 2, 2>, scalar_prefetch = 0 : i64, scratch_operands = 1 : i64, tpu.core_type = #tpu.core_type<tc>, window_params = [{transform_indices = @transform_0, window_bounds = array<i64: 1, 4, 128>}, {pipeline_mode = #tpu.pipeline_mode<synchronous>, transform_indices = @transform_1, window_bounds = array<i64: 64, 4>}, {pipeline_mode = #tpu.pipeline_mode<synchronous>, transform_indices = @transform_2, window_bounds = array<i64: 64, 1>}, {pipeline_mode = #tpu.pipeline_mode<synchronous>, transform_indices = @transform_3, window_bounds = array<i64: 64, 128>}, {pipeline_mode = #tpu.pipeline_mode<synchronous>, transform_indices = @transform_4, window_bounds = array<i64: 1, 128>}, {transform_indices = @transform_5, window_bounds = array<i64: 1, 1, 128>}]} {
    %c0_i32 = arith.constant 0 : i32
    %0 = arith.cmpi eq, %arg1, %c0_i32 : i32
    %1 = arith.extui %0 : i1 to i32
    %c0_i32_0 = arith.constant 0 : i32
    %2 = arith.cmpi ne, %1, %c0_i32_0 : i32
    scf.if %2 {
      %cst_16 = arith.constant 0.000000e+00 : f32
      %31 = vector.broadcast %cst_16 : f32 to vector<64x128xf32>
      %c0_17 = arith.constant 0 : index
      %c0_18 = arith.constant 0 : index
      %32 = vector.load %arg8[%c0_17, %c0_18] : memref<64x128xf32, #tpu.memory_space<vmem>>, vector<64x128xf32>
      tpu.vector_store %arg8[%c0_17, %c0_18], %31 {strides = array<i32>} : memref<64x128xf32, #tpu.memory_space<vmem>>, vector<64x128xf32>,
    } else {
    }
    %c0 = arith.constant 0 : index
    %c0_1 = arith.constant 0 : index
    %3 = vector.load %arg3[%c0, %c0_1] : memref<64x4xf32, #tpu.memory_space<vmem>>, vector<64x4xf32>
    %c0_2 = arith.constant 0 : index
    %c0_3 = arith.constant 0 : index
    %c0_4 = arith.constant 0 : index
    %4 = vector.load %arg2[%c0_2, %c0_3, %c0_4] : memref<1x4x128xf32, #tpu.memory_space<vmem>>, vector<1x4x128xf32>
    %5 = vector.shape_cast %4 : vector<1x4x128xf32> to vector<4x128xf32>
    %cst = arith.constant dense<0.000000e+00> : vector<64x128xf32>
    %6 = tpu.matmul %3, %5, %cst {dimension_numbers = #tpu.dot_dimension_numbers<[1], [0], [0], [1], [0, 0, 1, 1], [], []>} : vector<64x4xf32>, vector<4x128xf32>, vector<64x128xf32> -> vector<64x128xf32>
    %c0_5 = arith.constant 0 : index
    %c0_6 = arith.constant 0 : index
    %7 = vector.load %arg4[%c0_5, %c0_6] : memref<64x1xf32, #tpu.memory_space<vmem>>, vector<64x1xf32>
    %8 = vector.broadcast %7 : vector<64x1xf32> to vector<64x128xf32>
    %9 = arith.addf %6, %8 : vector<64x128xf32>
    %cst_7 = arith.constant 0.000000e+00 : f32
    %10 = vector.broadcast %cst_7 : f32 to vector<64x128xf32>
    %11 = arith.maximumf %9, %10 : vector<64x128xf32>
    %12 = arith.mulf %11, %11 : vector<64x128xf32>
    %cst_8 = arith.constant dense<0.000000e+00> : vector<128xf32>
    %13 = vector.multi_reduction <add>, %12, %cst_8 [0] : vector<64x128xf32> to vector<128xf32>
    %14 = vector.shape_cast %13 : vector<128xf32> to vector<1x128xf32>
    %cst_9 = arith.constant 1.000000e-24 : f32
    %15 = vector.broadcast %cst_9 : f32 to vector<1x128xf32>
    %16 = arith.maximumf %14, %15 : vector<1x128xf32>
    %17 = math.rsqrt %16 : vector<1x128xf32>
    %18 = arith.mulf %17, %17 : vector<1x128xf32>
    %19 = arith.mulf %18, %17 : vector<1x128xf32>
    %20 = arith.mulf %12, %11 : vector<64x128xf32>
    %21 = vector.broadcast %19 : vector<1x128xf32> to vector<64x128xf32>
    %22 = arith.mulf %20, %21 : vector<64x128xf32>
    %cst_10 = arith.constant 1.000000e-18 : f32
    %23 = vector.broadcast %cst_10 : f32 to vector<64x128xf32>
    %24 = arith.maximumf %22, %23 : vector<64x128xf32>
    %c0_11 = arith.constant 0 : index
    %c0_12 = arith.constant 0 : index
    %25 = vector.load %arg8[%c0_11, %c0_12] : memref<64x128xf32, #tpu.memory_space<vmem>>, vector<64x128xf32>
    %26 = arith.addf %25, %24 : vector<64x128xf32>
    %c0_13 = arith.constant 0 : index
    %c0_14 = arith.constant 0 : index
    %27 = vector.load %arg8[%c0_13, %c0_14] : memref<64x128xf32, #tpu.memory_space<vmem>>, vector<64x128xf32>
    tpu.vector_store %arg8[%c0_13, %c0_14], %26 {strides = array<i32>} : memref<64x128xf32, #tpu.memory_space<vmem>>, vector<64x128xf32>,
    %c1_i32 = arith.constant 1 : i32
    %28 = arith.cmpi eq, %arg1, %c1_i32 : i32
    %29 = arith.extui %28 : i1 to i32
    %c0_i32_15 = arith.constant 0 : i32
    %30 = arith.cmpi ne, %29, %c0_i32_15 : i32
    scf.if %30 {
      %c0_16 = arith.constant 0 : index
      %c0_17 = arith.constant 0 : index
      %31 = vector.load %arg8[%c0_16, %c0_17] : memref<64x128xf32, #tpu.memory_space<vmem>>, vector<64x128xf32>
      %cst_18 = arith.constant dense<0.000000e+00> : vector<64xf32>
      %32 = vector.multi_reduction <add>, %31, %cst_18 [1] : vector<64x128xf32> to vector<64xf32>
      %33 = vector.shape_cast %32 : vector<64xf32> to vector<64x1xf32>
      %cst_19 = arith.constant 3.906250e-03 : f32
      %34 = vector.broadcast %cst_19 : f32 to vector<64x1xf32>
      %35 = arith.mulf %33, %34 : vector<64x1xf32>
      %36 = math.log %35 : vector<64x1xf32>
      %cst_20 = arith.constant 0.333333343 : f32
      %37 = vector.broadcast %cst_20 : f32 to vector<64x1xf32>
      %38 = arith.mulf %36, %37 : vector<64x1xf32>
      %39 = math.exp %38 : vector<64x1xf32>
      %c0_21 = arith.constant 0 : index
      %c0_22 = arith.constant 0 : index
      %40 = vector.load %arg5[%c0_21, %c0_22] : memref<64x128xf32, #tpu.memory_space<vmem>>, vector<64x128xf32>
      %41 = vector.broadcast %39 : vector<64x1xf32> to vector<64x128xf32>
      %42 = arith.mulf %41, %40 : vector<64x128xf32>
      %cst_23 = arith.constant dense<0.000000e+00> : vector<128xf32>
      %43 = vector.multi_reduction <add>, %42, %cst_23 [0] : vector<64x128xf32> to vector<128xf32>
      %44 = vector.shape_cast %43 : vector<128xf32> to vector<1x128xf32>
      %c0_24 = arith.constant 0 : index
      %c0_25 = arith.constant 0 : index
      %45 = vector.load %arg6[%c0_24, %c0_25] : memref<1x128xf32, #tpu.memory_space<vmem>>, vector<1x128xf32>
      %46 = arith.addf %44, %45 : vector<1x128xf32>
      %47 = arith.mulf %46, %46 : vector<1x128xf32>
      %cst_26 = arith.constant dense<0.000000e+00> : vector<1xf32>
      %48 = vector.multi_reduction <add>, %47, %cst_26 [1] : vector<1x128xf32> to vector<1xf32>
      %49 = vector.shape_cast %48 : vector<1xf32> to vector<1x1xf32>
      %cst_27 = arith.constant 1.000000e-24 : f32
      %50 = vector.broadcast %cst_27 : f32 to vector<1x1xf32>
      %51 = arith.maximumf %49, %50 : vector<1x1xf32>
      %52 = math.rsqrt %51 : vector<1x1xf32>
      %53 = vector.broadcast %52 : vector<1x1xf32> to vector<1x128xf32>
      %54 = arith.mulf %46, %53 : vector<1x128xf32>
      %c0_28 = arith.constant 0 : index
      %c0_29 = arith.constant 0 : index
      %c0_30 = arith.constant 0 : index
      %55 = vector.load %arg7[%c0_28, %c0_29, %c0_30] : memref<1x1x128xf32, #tpu.memory_space<vmem>>, vector<1x1x128xf32>
      %56 = vector.shape_cast %55 : vector<1x1x128xf32> to vector<1x128xf32>
      %57 = vector.shape_cast %54 : vector<1x128xf32> to vector<1x1x128xf32>
      tpu.vector_store %arg7[%c0_28, %c0_29, %c0_30], %57 {strides = array<i32>} : memref<1x1x128xf32, #tpu.memory_space<vmem>>, vector<1x1x128xf32>,
    } else {
    }
    return
  }
  func.func @transform_0(%arg0: i32, %arg1: i32) -> (i32, i32, i32) {
    %c0_i32 = arith.constant 0 : i32
    %c0_i32_0 = arith.constant 0 : i32
    return %arg0, %c0_i32, %arg1 : i32, i32, i32
  }
  func.func @transform_1(%arg0: i32, %arg1: i32) -> (i32, i32) {
    %c0_i32 = arith.constant 0 : i32
    %c0_i32_0 = arith.constant 0 : i32
    %c0_i32_1 = arith.constant 0 : i32
    return %c0_i32, %c0_i32_0 : i32, i32
  }
  func.func @transform_2(%arg0: i32, %arg1: i32) -> (i32, i32) {
    %c0_i32 = arith.constant 0 : i32
    %c0_i32_0 = arith.constant 0 : i32
    %c0_i32_1 = arith.constant 0 : i32
    return %c0_i32, %c0_i32_0 : i32, i32
  }
  func.func @transform_3(%arg0: i32, %arg1: i32) -> (i32, i32) {
    %c0_i32 = arith.constant 0 : i32
    %c0_i32_0 = arith.constant 0 : i32
    %c0_i32_1 = arith.constant 0 : i32
    return %c0_i32, %c0_i32_0 : i32, i32
  }
  func.func @transform_4(%arg0: i32, %arg1: i32) -> (i32, i32) {
    %c0_i32 = arith.constant 0 : i32
    %c0_i32_0 = arith.constant 0 : i32
    %c0_i32_1 = arith.constant 0 : i32
    return %c0_i32, %c0_i32_0 : i32, i32
  }
  func.func @transform_5(%arg0: i32, %arg1: i32) -> (i32, i32, i32) {
    %c0_i32 = arith.constant 0 : i32
    %c0_i32_0 = arith.constant 0 : i32
    %c0_i32_1 = arith.constant 0 : i32
    return %arg0, %c0_i32, %c0_i32_0 : i32, i32, i32
  }
}

</mosaic_0001>

<bundles_post_ra>
// kernel: tpu_custom_call.1
= control target key start
LH: loop header
LB: loop body
LE: loop exit
PB: predicated region body
PF: predicated region fallthrough
CT: control target
= control target key end

     0   :  { %10 = vsyncpa [#allocation4], 0  ;;  %s1237_s0 = inlined_call_operand.vmem [shape: f32[2,4,256], index: 0, kind: input, shape index: {}]   ;;  %s1238_s1 = inlined_call_operand.vmem [shape: f32[64,4], index: 1, kind: input, shape index: {}]   ;;  %s1239_s2 = inlined_call_operand.vmem [shape: f32[64,1], index: 2, kind: input, shape index: {}]   ;;  %s1240_s3 = inlined_call_operand.vmem [shape: f32[64,128], index: 3, kind: input, shape index: {}]   ;;  %s1241_s4 = inlined_call_operand.vmem [shape: f32[1,128], index: 4, kind: input, shape index: {}]   ;;  %s1242_s5 = inlined_call_operand.hbm [shape: f32[2,1,128], index: 5, kind: output, shape index: {}]  }
   0x1   :  { %12 = vsyncpa [#allocation4 + $0x1], 0  ;;  %s1016_s18 = smov 0   ;;  %s1018_s19 = smov 0  }
   0x2   :  { %s1020_s20 = smov 0   ;;  %s1022_s21 = smov 0  }
   0x3   :  { %s1024_s22 = smov 0   ;;  %s1026_s23 = smov 0  }
   0x4   :  { %s1028_s24 = smov 0   ;;  %s1030_s25 = smov 0  }
   0x5 LB: > { %s730_s26 = sadd.s32 4294967295, %s981_s25   ;;  %s731_s27 = sadd.s32 4294967294, %s981_s25   ;;  %s981_s25 = sphi %s1030_s25, %s18_s25   ;;  %s977_s24 = sphi %s1028_s24, %s1251_s24   ;;  %s973_s23 = sphi %s1026_s23, %s1250_s23   ;;  %s969_s22 = sphi %s1024_s22, %s1249_s22   ;;  %s965_s21 = sphi %s1022_s21, %s1248_s21   ;;  %s961_s20 = sphi %s1020_s20, %s1247_s20   ;;  %s957_s19 = sphi %s1018_s19, %s1246_s19   ;;  %s953_s18 = sphi %s1016_s18, %s1245_s18  }
   0x6   : > { %s27_s28 = sadd.s32 1, %s973_s23  ;;  %s30_s29 = sadd.s32 1, %s977_s24 }
   0x7   : > { %p28_p0 = scmp.ge.s32.totalorder %s27_s28, 2  ;;  %p159_p1 = scmp.ne.s32.totalorder %s961_s20, %s957_s19 }
   0x8   : > { %p160_p2 = scmp.eq.s32.totalorder %s730_s26, 3  ;;  %p165_p4 = scmp.ne.s32.totalorder %s957_s19, %s953_s18 }
   0x9   : > { %s1253_s28 = smov (%p28_p0, %s27_s28), 0  ;;  %s1255_s29 = smov (!%p28_p0, %s30_s29), %s977_s24 }
   0xa   : > { %p1065_p3 = por %p160_p2, %p159_p1  ;;  %p32_p5 = scmp.ge.s32.totalorder %s1255_s29, 2 }
   0xb   : > { %p166_p6 = scmp.eq.s32.totalorder %s731_s27, 3  ;;  %p734_p7 = scmp.ge.s32.totalorder %s981_s25, 1 }
   0xc   : > { %p207_p8 = scmp.lt.s32.totalorder %s981_s25, 5  ;;  %s1257_s29 = smov (%p32_p5, %s1255_s29), 0 }
   0xd   : > { %p1075_p9 = por %p166_p6, %p165_p4  ;;  %s146_s7 = ssub.s32 %s977_s24, %s1257_s29 }
   0xe   : > { %p208_p10 = pnand %p734_p7, %p207_p8  ;;  %s149_s8 = sadd.s32 1, %s961_s20 }
   0xf   : > { %p147_p11 = scmp.eq.s32.totalorder %s146_s7, 0  ;;  %s235_s10 = sand.u32 (!%p208_p10), 1, %s957_s19  }
  0x10   : > { %211 = sbr.rel (%p208_p10) target bundleno = 705 (0x2c1), region = 40  ;;  %p237_p12 = scmp.lt.s32.totalorder (!%p208_p10), %s969_s22, 1 }
  0x11   : > { %s1083_s9 = scalar_select %p147_p11, %s961_s20, %s149_s8  }
  0x12   : > { %p239_p13 = scmp.lt.s32.totalorder (!%p208_p10), %s965_s21, 1  ;;  %s1095_s27 = scalar_lea.vmem (!%p208_p10), [#allocation3], %s235_s10 }
  0x13   : > { %p737_p0 = scmp.ne.s32.totalorder (!%p208_p10), %s965_s21, 0 }
  0x17   : > { %s238_s11 = scalar_select %p237_p12, %s969_s22, 1 }
  0x18   : > { %s240_s12 = scalar_select %p239_p13, %s965_s21, 1 }
  0x19   : > { %s735_s13 = sshll.u32 %s238_s11, 1  ;;  %248 = sbr.rel (%p737_p0) target bundleno = 32 (0x20), region = 44  ;;  %v983_v0 = vmov (!%p737_p0), 0.0  }
  0x1a   : > { %s242_s14 = sadd.s32 %s735_s13, %s240_s12  ;;  %249 = vst [vmem:[#allocation2] sm:$0xff] (!%p737_p0), %v983_v0  ;;  %250 = vst [vmem:[#allocation2 + $0x8] sm:$0xff] (!%p737_p0), %v983_v0 }
  0x1b   : > { %s736_s15 = sshll.u32 %s242_s14, 2  ;;  %251 = vst [vmem:[#allocation2 + $0x10] sm:$0xff] (!%p737_p0), %v983_v0  ;;  %252 = vst [vmem:[#allocation2 + $0x18] sm:$0xff] (!%p737_p0), %v983_v0 }
  0x1c   : > { %s244_s26 = scalar_lea.vmem %s1237_s0, %s736_s15  ;;  %253 = vst [vmem:[#allocation2 + $0x20] sm:$0xff] (!%p737_p0), %v983_v0  ;;  %254 = vst [vmem:[#allocation2 + $0x28] sm:$0xff] (!%p737_p0), %v983_v0 }
  0x1d   : > { %255 = vst [vmem:[#allocation2 + $0x30] sm:$0xff] (!%p737_p0), %v983_v0  ;;  %256 = vst [vmem:[#allocation2 + $0x38] sm:$0xff] (!%p737_p0), %v983_v0 }
  0x20 PF: > { %v265_v1 = vld [vmem:[%s244_s26] sm:$0xf]  ;;  %vm339_vm0 = vcmask 1043456   ;;  %vm314_vm1 = vcmask 31744   ;;  %v258_v4 = vld [vmem:[%s1238_s1 + $0x8] sm:$0xff]  ;;  %v259_v6 = vld [vmem:[%s1238_s1 + $0x10] sm:$0xff] }
  0x21   : > { %v257_v2 = vld [vmem:[%s1238_s1] sm:$0xff]  ;;  %760 = vmatprep.subr.msk.mxu0 %vm339_vm0, %v265_v1  ;;  %774 = vmatprep.subr.msk.mxu1 %vm339_vm0, %v265_v1  ;;  %v262_v5 = vld [vmem:[%s1238_s1 + $0x28] sm:$0xff]  ;;  %v263_v7 = vld [vmem:[%s1238_s1 + $0x30] sm:$0xff]  ;;  %v984_v12 = vmov 0   ;;  %p747_p1 = scmp.ne.s32.totalorder %s965_s21, 1 }
  0x22   : > { %v261_v3 = vld [vmem:[%s1238_s1 + $0x20] sm:$0xff]  ;;  %761 = vmatpush3.msk.msra.mxu0 %vm339_vm0, %v265_v1  ;;  %775 = vmatpush3.msk.msra.mxu1 %vm339_vm0, %v265_v1  ;;  %v268_v9 = vld [vmem:[%s1239_s2 + $0x10] sm:$0xff]  ;;  %v260_v10 = vld [vmem:[%s1238_s1 + $0x18] sm:$0xff]  ;;  %vm637_vm2 = vcmask (!%p747_p1), 1040384  }
  0x23   : > { %762 = vmatprep.mubr.msk.f32.mxu0 %vm314_vm1, %v257_v2  ;;  %768 = vmatprep.mubr.msk.f32.mxu1 %vm314_vm1, %v261_v3  ;;  %v266_v8 = vld [vmem:[%s1239_s2] sm:$0xff]  ;;  %v264_v11 = vld [vmem:[%s1238_s1 + $0x38] sm:$0xff]  ;;  %v267_v13 = vld [vmem:[%s1239_s2 + $0x8] sm:$0xff] }
  0x24   : > { %763 = vmatmul.mubr.msk.f32.vlgmr.msra.gmra.mrb[0].mxu0 %vm314_vm1, %v258_v4  ;;  %769 = vmatmul.mubr.msk.f32.vlgmr.msra.gmra.mrb[0].mxu1 %vm314_vm1, %v262_v5  ;;  %v269_v14 = vld [vmem:[%s1239_s2 + $0x18] sm:$0xff]  ;;  %v270_v15 = vld [vmem:[%s1239_s2 + $0x20] sm:$0xff]  ;;  %v271_v16 = vld [vmem:[%s1239_s2 + $0x28] sm:$0xff] }
  0x25   : > { %765 = vmatprep.mubr.msk.f32.mxu0 %vm314_vm1, %v259_v6  ;;  %771 = vmatprep.mubr.msk.f32.mxu1 %vm314_vm1, %v263_v7  ;;  %v272_v17 = vld [vmem:[%s1239_s2 + $0x30] sm:$0xff]  ;;  %v273_v18 = vld [vmem:[%s1239_s2 + $0x38] sm:$0xff] }
  0x26   : > { %849 = vset.pattern.permute.xlu0 %v984_v12  ;;  %850 = vset.pattern.permute.xlu1 %v984_v12 }
  0x27   : > { %276 = vperm.xlu0 %849, %v266_v8   ;;  %286 = vperm.xlu1 %850, %v268_v9  }
  0x28   : > { %766 = vmatmul.mubr.msk.f32.gmra.mrb[2].mxu0 %vm314_vm1, %v260_v10  ;;  %772 = vmatmul.mubr.msk.f32.gmra.mrb[2].mxu1 %vm314_vm1, %v264_v11 }
  0x2b   : > { %281 = vperm.xlu0 %849, %v267_v13   ;;  %291 = vperm.xlu1 %850, %v269_v14  }
  0x2f   : > { %296 = vperm.xlu0 %849, %v270_v15   ;;  %301 = vperm.xlu1 %850, %v271_v16  }
  0x33   : > { %306 = vperm.xlu0 %849, %v272_v17   ;;  %311 = vperm.xlu1 %850, %v273_v18  }
  0xa6   : > { %v277_v19 = vpop.permute.xlu0 %276  ;;  %v287_v20 = vpop.permute.xlu1 %286 }
  0xaa   : > { %v282_v21 = vpop.permute.xlu0 %281  ;;  %v292_v22 = vpop.permute.xlu1 %291 }
  0xae   : > { %v297_v29 = vpop.permute.xlu0 %296  ;;  %v302_v30 = vpop.permute.xlu1 %301 }
  0xb2   : > { %v307_v46 = vpop.permute.xlu0 %306  ;;  %v312_v47 = vpop.permute.xlu1 %311 }
  0xf7   : > { %v764_v23 = vpop.f32.mrb[0].mxu0  ;;  %v770_v24 = vpop.f32.mrb[0].mxu1 }
  0xf8   : > { %v415_v25 = vadd.f32 %v764_v23, %v282_v21  ;;  %v409_v26 = vpop.f32.mrb[1].mxu0  ;;  %v429_v27 = vpop.f32.mrb[1].mxu1  ;;  %v435_v42 = vadd.f32 %v770_v24, %v302_v30  ;;  %v506_v21 = vld [vmem:[#allocation2 + $0x8] sm:$0xff] }
  0xf9   : > { %v410_v28 = vadd.f32 %v409_v26, %v277_v19  ;;  %v430_v40 = vadd.f32 %v429_v27, %v297_v29  ;;  %v507_v26 = vld [vmem:[#allocation2 + $0x10] sm:$0xff]  ;;  %v508_v27 = vld [vmem:[#allocation2 + $0x18] sm:$0xff] }
  0xfa   : > { %v449_v31 = vmax.f32 %v415_v25, 0.0  ;;  %v453_v51 = vmax.f32 %v435_v42, 0.0 }
  0xfb   : > { %v448_v32 = vmax.f32 %v410_v28, 0.0  ;;  %v767_v33 = vpop.f32.mrb[2].mxu0  ;;  %v773_v34 = vpop.f32.mrb[2].mxu1  ;;  %v452_v48 = vmax.f32 %v430_v40, 0.0  ;;  %v509_v28 = vld [vmem:[#allocation2 + $0x20] sm:$0xff] }
  0xfc   : > { %v457_v35 = vmul.f32 %v449_v31, %v449_v31  ;;  %v425_v36 = vadd.f32 %v767_v33, %v292_v22  ;;  %v419_v37 = vpop.f32.mrb[3].mxu0  ;;  %v439_v38 = vpop.f32.mrb[3].mxu1  ;;  %v445_v53 = vadd.f32 %v773_v34, %v312_v47  ;;  %v461_v58 = vmul.f32 %v453_v51, %v453_v51  ;;  %v510_v33 = vld [vmem:[#allocation2 + $0x28] sm:$0xff]  ;;  %v511_v34 = vld [vmem:[#allocation2 + $0x30] sm:$0xff] }
  0xfd   : > { %v456_v39 = vmul.f32 %v448_v32, %v448_v32  ;;  %v420_v41 = vadd.f32 %v419_v37, %v287_v20  ;;  %v440_v50 = vadd.f32 %v439_v38, %v307_v46  ;;  %v460_v55 = vmul.f32 %v452_v48, %v452_v48  ;;  %v505_v20 = vld [vmem:[#allocation2] sm:$0xff] }
  0xfe   : > { %v451_v44 = vmax.f32 %v425_v36, 0.0  ;;  %v455_v59 = vmax.f32 %v445_v53, 0.0  ;;  %v482_v11 = vmul.f32 %v457_v35, %v449_v31  ;;  %v486_v16 = vmul.f32 %v461_v58, %v453_v51 }
  0xff   : > { %v464_v43 = vadd.f32 %v457_v35, %v456_v39  ;;  %v450_v45 = vmax.f32 %v420_v41, 0.0  ;;  %v454_v57 = vmax.f32 %v440_v50, 0.0  ;;  %v481_v12 = vmul.f32 %v456_v39, %v448_v32  ;;  %v512_v35 = vld [vmem:[#allocation2 + $0x38] sm:$0xff] }
 0x100   : > { %v459_v52 = vmul.f32 %v451_v44, %v451_v44  ;;  %v463_v63 = vmul.f32 %v455_v59, %v455_v59  ;;  %v485_v17 = vmul.f32 %v460_v55, %v452_v48 }
 0x101   : > { %v458_v49 = vmul.f32 %v450_v45, %v450_v45  ;;  %v462_v61 = vmul.f32 %v454_v57, %v454_v57 }
 0x102   : > { %v484_v13 = vmul.f32 %v459_v52, %v451_v44  ;;  %v488_v18 = vmul.f32 %v463_v63, %v455_v59 }
 0x103   : > { %v465_v54 = vadd.f32 %v464_v43, %v458_v49  ;;  %v483_v14 = vmul.f32 %v458_v49, %v450_v45  ;;  %v487_v19 = vmul.f32 %v462_v61, %v454_v57 }
 0x105   : > { %v466_v56 = vadd.f32 %v465_v54, %v459_v52 }
 0x107   : > { %v467_v60 = vadd.f32 %v466_v56, %v460_v55 }
 0x109   : > { %v468_v62 = vadd.f32 %v467_v60, %v461_v58 }
 0x10b   : > { %v469_v0 = vadd.f32 %v468_v62, %v462_v61 }
 0x10d   : > { %v470_v1 = vadd.f32 %v469_v0, %v463_v63 }
 0x10f   : > { %v471_v2 = vrot.slane %v470_v1, 4 }
 0x111   : > { %v472_v3 = vadd.f32 %v471_v2, %v470_v1 }
 0x113   : > { %v473_v4 = vrot.slane %v472_v3, 2 }
 0x115   : > { %v474_v5 = vadd.f32 %v473_v4, %v472_v3 }
 0x117   : > { %v475_v6 = vrot.slane %v474_v5, 1 }
 0x119   : > { %v476_v7 = vadd.f32 %v475_v6, %v474_v5 }
 0x11b   : > { %v477_v8 = vmax.f32 %v476_v7, 1e-24 }
 0x11d   : > { %851 = vrsqrt.f32 %v477_v8 }
 0x127   : > { %v852_v9 = vpop.eup %851 }
 0x128   : > { %v479_v10 = vmul.f32 %v852_v9, %v852_v9 }
 0x12a   : > { %v480_v15 = vmul.f32 %v852_v9, %v479_v10 }
 0x12c   : > { %v489_v22 = vmul.f32 %v481_v12, %v480_v15  ;;  %v490_v23 = vmul.f32 %v482_v11, %v480_v15  ;;  %v491_v24 = vmul.f32 %v483_v14, %v480_v15  ;;  %v492_v25 = vmul.f32 %v484_v13, %v480_v15 }
 0x12d   : > { %v493_v29 = vmul.f32 %v485_v17, %v480_v15  ;;  %v494_v30 = vmul.f32 %v486_v16, %v480_v15  ;;  %v495_v31 = vmul.f32 %v487_v19, %v480_v15  ;;  %v496_v32 = vmul.f32 %v488_v18, %v480_v15 }
 0x12e   : > { %v497_v36 = vmax.f32 %v489_v22, 1e-18  ;;  %v498_v37 = vmax.f32 %v490_v23, 1e-18  ;;  %v499_v38 = vmax.f32 %v491_v24, 1e-18 }
 0x12f   : > { %v500_v39 = vmax.f32 %v492_v25, 1e-18  ;;  %v501_v40 = vmax.f32 %v493_v29, 1e-18  ;;  %v502_v41 = vmax.f32 %v494_v30, 1e-18 }
 0x130   : > { %v503_v42 = vmax.f32 %v495_v31, 1e-18  ;;  %v504_v43 = vmax.f32 %v496_v32, 1e-18  ;;  %v513_v44 = vadd.f32 %v505_v20, %v497_v36  ;;  %v514_v45 = vadd.f32 %v506_v21, %v498_v37  ;;  %532 = sbr.rel (%p747_p1) target bundleno = 681 (0x2a9), region = 48 }
 0x131   : > { %v515_v46 = vadd.f32 %v507_v26, %v499_v38  ;;  %v516_v47 = vadd.f32 %v508_v27, %v500_v39  ;;  %v517_v48 = vadd.f32 %v509_v28, %v501_v40  ;;  %v518_v49 = vadd.f32 %v510_v33, %v502_v41 }
 0x132   : > { %v519_v50 = vadd.f32 %v511_v34, %v503_v42  ;;  %v520_v51 = vadd.f32 %v512_v35, %v504_v43  ;;  %521 = vst [vmem:[#allocation2] sm:$0xff] %v513_v44  ;;  %522 = vst [vmem:[#allocation2 + $0x8] sm:$0xff] %v514_v45  ;;  %v605_v45 = vld [vmem:[%s1240_s3] sm:$0xff] (!%p747_p1) }
 0x133   : > { %523 = vst [vmem:[#allocation2 + $0x10] sm:$0xff] %v515_v46  ;;  %524 = vst [vmem:[#allocation2 + $0x18] sm:$0xff] %v516_v47  ;;  %v606_v46 = vld [vmem:[%s1240_s3 + $0x8] sm:$0xff] (!%p747_p1) }
 0x134   : > { %525 = vst [vmem:[#allocation2 + $0x20] sm:$0xff] %v517_v48  ;;  %526 = vst [vmem:[#allocation2 + $0x28] sm:$0xff] %v518_v49  ;;  %v607_v49 = vld [vmem:[%s1240_s3 + $0x10] sm:$0xff] (!%p747_p1) }
 0x135   : > { %527 = vst [vmem:[#allocation2 + $0x30] sm:$0xff] %v519_v50  ;;  %528 = vst [vmem:[#allocation2 + $0x38] sm:$0xff] %v520_v51  ;;  %v608_v50 = vld [vmem:[%s1240_s3 + $0x18] sm:$0xff] (!%p747_p1) }
 0x139   : > { %v533_v52 = vld [vmem:[#allocation2] sm:$0xff]  ;;  %v534_v54 = vld [vmem:[#allocation2 + $0x8] sm:$0xff] }
 0x13a   : > { %v535_v53 = vld [vmem:[#allocation2 + $0x10] sm:$0xff]  ;;  %541 = vadd.xlane.f32.xlu0 %v533_v52  ;;  %v536_v55 = vld [vmem:[#allocation2 + $0x18] sm:$0xff] }
 0x13b   : > { %545 = vadd.xlane.f32.xlu1 %v535_v53  ;;  %v537_v56 = vld [vmem:[#allocation2 + $0x20] sm:$0xff]  ;;  %v538_v57 = vld [vmem:[#allocation2 + $0x28] sm:$0xff] }
 0x13c   : > { %v539_v58 = vld [vmem:[#allocation2 + $0x30] sm:$0xff]  ;;  %v540_v59 = vld [vmem:[#allocation2 + $0x38] sm:$0xff] }
 0x13e   : > { %543 = vadd.xlane.f32.xlu0 %v534_v54  ;;  %v609_v54 = vld [vmem:[%s1240_s3 + $0x20] sm:$0xff] }
 0x13f   : > { %547 = vadd.xlane.f32.xlu1 %v536_v55 }
 0x142   : > { %549 = vadd.xlane.f32.xlu0 %v537_v56 }
 0x143   : > { %551 = vadd.xlane.f32.xlu1 %v538_v57 }
 0x146   : > { %553 = vadd.xlane.f32.xlu0 %v539_v58 }
 0x147   : > { %555 = vadd.xlane.f32.xlu1 %v540_v59  ;;  %v610_v59 = vld [vmem:[%s1240_s3 + $0x28] sm:$0xff] }
 0x1c7   : > { %v542_v60 = vpop.xlane.xlu0 %541 }
 0x1c8   : > { %v546_v61 = vpop.xlane.xlu1 %545  ;;  %v557_v62 = vmul.f32 0.00390625, %v542_v60 }
 0x1c9   : > { %v559_v63 = vmul.f32 0.00390625, %v546_v61 }
 0x1ca   : > { %853 = vlog2.f32 %v557_v62 }
 0x1cb   : > { %855 = vlog2.f32 %v559_v63  ;;  %v544_v0 = vpop.xlane.xlu0 %543  ;;  %v611_v63 = vld [vmem:[%s1240_s3 + $0x30] sm:$0xff] }
 0x1cc   : > { %v548_v1 = vpop.xlane.xlu1 %547  ;;  %v558_v2 = vmul.f32 0.00390625, %v544_v0 }
 0x1cd   : > { %v560_v3 = vmul.f32 0.00390625, %v548_v1 }
 0x1ce   : > { %857 = vlog2.f32 %v558_v2 }
 0x1cf   : > { %859 = vlog2.f32 %v560_v3  ;;  %v550_v4 = vpop.xlane.xlu0 %549  ;;  %v612_v3 = vld [vmem:[%s1240_s3 + $0x38] sm:$0xff] }
 0x1d0   : > { %v552_v5 = vpop.xlane.xlu1 %551  ;;  %v561_v6 = vmul.f32 0.00390625, %v550_v4 }
 0x1d1   : > { %v562_v7 = vmul.f32 0.00390625, %v552_v5 }
 0x1d2   : > { %861 = vlog2.f32 %v561_v6 }
 0x1d3   : > { %863 = vlog2.f32 %v562_v7  ;;  %v554_v8 = vpop.xlane.xlu0 %553 }
 0x1d4   : > { %v556_v9 = vpop.xlane.xlu1 %555  ;;  %v854_v10 = vpop.eup %853  ;;  %v563_v11 = vmul.f32 0.00390625, %v554_v8 }
 0x1d5   : > { %v564_v12 = vmul.f32 0.00390625, %v556_v9  ;;  %v856_v13 = vpop.eup %855  ;;  %v566_v14 = vmul.f32 0.6931472, %v854_v10 }
 0x1d6   : > { %v570_v15 = vmul.f32 0.6931472, %v856_v13  ;;  %865 = vlog2.f32 %v563_v11 }
 0x1d7   : > { %v581_v16 = vmul.f32 0.33333334, %v566_v14  ;;  %867 = vlog2.f32 %v564_v12 }
 0x1d8   : > { %v858_v17 = vpop.eup %857  ;;  %v583_v18 = vmul.f32 0.33333334, %v570_v15 }
 0x1d9   : > { %v860_v19 = vpop.eup %859  ;;  %v589_v20 = vmul.f32 1.442695, %v581_v16  ;;  %v568_v21 = vmul.f32 0.6931472, %v858_v17  ;;  %v634_v16 = vld [vmem:[%s1241_s4] sm:$0x1] }
 0x1da   : > { %v593_v22 = vmul.f32 1.442695, %v583_v18  ;;  %v572_v23 = vmul.f32 0.6931472, %v860_v19 }
 0x1db   : > { %v582_v24 = vmul.f32 0.33333334, %v568_v21  ;;  %869 = vpow2.f32 %v589_v20 }
 0x1dc   : > { %v862_v25 = vpop.eup %861  ;;  %v584_v26 = vmul.f32 0.33333334, %v572_v23  ;;  %871 = vpow2.f32 %v593_v22 }
 0x1dd   : > { %v864_v27 = vpop.eup %863  ;;  %v591_v28 = vmul.f32 1.442695, %v582_v24  ;;  %v574_v29 = vmul.f32 0.6931472, %v862_v25 }
 0x1de   : > { %v595_v30 = vmul.f32 1.442695, %v584_v26  ;;  %v576_v31 = vmul.f32 0.6931472, %v864_v27 }
 0x1df   : > { %873 = vpow2.f32 %v591_v28  ;;  %v585_v32 = vmul.f32 0.33333334, %v574_v29 }
 0x1e0   : > { %v866_v33 = vpop.eup %865  ;;  %875 = vpow2.f32 %v595_v30  ;;  %v586_v34 = vmul.f32 0.33333334, %v576_v31 }
 0x1e1   : > { %v868_v35 = vpop.eup %867  ;;  %v597_v36 = vmul.f32 1.442695, %v585_v32  ;;  %v578_v37 = vmul.f32 0.6931472, %v866_v33 }
 0x1e2   : > { %v599_v38 = vmul.f32 1.442695, %v586_v34  ;;  %v580_v39 = vmul.f32 0.6931472, %v868_v35 }
 0x1e3   : > { %877 = vpow2.f32 %v597_v36  ;;  %v587_v40 = vmul.f32 0.33333334, %v578_v37 }
 0x1e4   : > { %879 = vpow2.f32 %v599_v38  ;;  %v588_v41 = vmul.f32 0.33333334, %v580_v39 }
 0x1e5   : > { %v601_v42 = vmul.f32 1.442695, %v587_v40  ;;  %v870_v44 = vpop.eup %869 }
 0x1e6   : > { %v603_v43 = vmul.f32 1.442695, %v588_v41  ;;  %v872_v47 = vpop.eup %871  ;;  %v613_v52 = vmul.f32 %v870_v44, %v605_v45 }
 0x1e7   : > { %881 = vpow2.f32 %v601_v42  ;;  %v615_v55 = vmul.f32 %v872_v47, %v607_v49 }
 0x1e8   : > { %883 = vpow2.f32 %v603_v43 }
 0x1e9   : > { %v874_v48 = vpop.eup %873 }
 0x1ea   : > { %v876_v51 = vpop.eup %875  ;;  %v614_v53 = vmul.f32 %v874_v48, %v606_v46 }
 0x1eb   : > { %v616_v57 = vmul.f32 %v876_v51, %v608_v50 }
 0x1ec   : > { %v621_v56 = vadd.f32 %v614_v53, %v613_v52 }
 0x1ed   : > { %v878_v58 = vpop.eup %877 }
 0x1ee   : > { %v880_v60 = vpop.eup %879  ;;  %v622_v61 = vadd.f32 %v621_v56, %v615_v55  ;;  %v617_v62 = vmul.f32 %v878_v58, %v609_v54 }
 0x1ef   : > { %v618_v1 = vmul.f32 %v880_v60, %v610_v59 }
 0x1f0   : > { %v623_v0 = vadd.f32 %v622_v61, %v616_v57 }
 0x1f1   : > { %v882_v2 = vpop.eup %881 }
 0x1f2   : > { %v884_v4 = vpop.eup %883  ;;  %v624_v5 = vadd.f32 %v623_v0, %v617_v62  ;;  %v619_v6 = vmul.f32 %v882_v2, %v611_v63 }
 0x1f3   : > { %v620_v7 = vmul.f32 %v884_v4, %v612_v3 }
 0x1f4   : > { %v625_v8 = vadd.f32 %v624_v5, %v618_v1 }
 0x1f6   : > { %v626_v9 = vadd.f32 %v625_v8, %v619_v6 }
 0x1f8   : > { %v627_v10 = vadd.f32 %v626_v9, %v620_v7 }
 0x1fa   : > { %v628_v11 = vrot.slane %v627_v10, 4 }
 0x1fc   : > { %v629_v12 = vadd.f32 %v628_v11, %v627_v10 }
 0x1fe   : > { %v630_v13 = vrot.slane %v629_v12, 2 }
 0x200   : > { %v631_v14 = vadd.f32 %v630_v13, %v629_v12 }
 0x202   : > { %v632_v15 = vrot.slane %v631_v14, 1 }
 0x204   : > { %v633_v17 = vadd.f32 %v632_v15, %v631_v14 }
 0x206   : > { %v635_v18 = vadd.f32 %v634_v16, %v633_v17 }
 0x208   : > { %v636_v19 = vmul.f32 %v635_v18, %v635_v18 }
 0x20a   : > { %v638_v20 = vsel %vm637_vm2, %v636_v19, 0.0 }
 0x20b   : > { %639 = vadd.xlane.f32.xlu0 %v638_v20 }
 0x298   : > { %v640_v21 = vpop.xlane.xlu0 %639 }
 0x299   : > { %v641_v22 = vmax.f32 %v640_v21, 1e-24 }
 0x29b   : > { %885 = vrsqrt.f32 %v641_v22 }
 0x2a5   : > { %v886_v23 = vpop.eup %885 }
 0x2a6   : > { %v643_v24 = vmul.f32 %v886_v23, %v635_v18 }
 0x2a8   : > { %644 = vst [vmem:[%s1095_s27] sm:$0x1] %v643_v24 }
 0x2a9 PF: > { %s748_s17 = sshll.u32 %s969_s22, 4  ;;  %s658_s21 = sshll.u32 %s1095_s27, 4  ;;  %s659_s21 = int_to_ptr.vmem [resolvable:$true] %s658_s21 }
 0x2aa   : > { %s1187_s8 = scalar_lea.hbm %s1242_s5, %s748_s17  ;;  %s646_s11 = scalar_lea.sflag [#allocation4], %s235_s10 }
 0x2ab   : > { %s887_s12 = scalar_lea.vmem %s659_s21, 16  ;;  %s985_s13 = smov [#allocation3]  }
 0x2ac   : > { %p888_p2 = scmp.ne.s32.totalorder %s659_s21, %s887_s12  ;;  %s891_s14 = sshll.u32 %s985_s13, 4  ;;  %s892_s14 = int_to_ptr.vmem [resolvable:$false] %s891_s14 }
 0x2ad   : > { %s893_s15 = scalar_lea.vmem %s892_s14, 32  ;;  %p894_p6 = scmp.lt.s32.totalorder %s659_s21, %s892_s14 }
 0x2ae   : > { %p889_p4 = pnand %p888_p2, %p1065_p3  ;;  %p895_p7 = scmp.lt.s32.totalorder %s893_s15, %s887_s12 }
 0x2b0   : > { %p890_p5 = pneg %p889_p4  ;;  %p896_p8 = por %p895_p7, %p894_p6 }
 0x2b2   : > { %p897_p10 = pnand %p896_p8, %p890_p5 }
 0x2b4   : > { %900 = shalt.err (!%p897_p10)
}
 0x2b5   : > { %s901_s22 = scalar_lea.hbm %s1187_s8, 16  ;;  %s905_s16 = scalar_lea.hbm %s1242_s5, 32 }
 0x2b6   : > { %p902_p11 = scmp.ne.s32.totalorder %s1187_s8, %s901_s22  ;;  %p906_p0 = scmp.lt.u32.totalorder %s1187_s8, %s1242_s5 }
 0x2b7   : > { %p907_p1 = scmp.lt.u32.totalorder %s905_s16, %s901_s22  ;;  %p909_p4 = scmp.lt.u32.totalorder %s901_s22, %s1187_s8 }
 0x2b8   : > { %p903_p12 = pnand %p902_p11, %p1065_p3 }
 0x2b9   : > { %p908_p2 = por %p907_p1, %p906_p0 }
 0x2ba   : > { %p904_p13 = pneg %p903_p12 }
 0x2bb   : > { %p910_p5 = por %p909_p4, %p908_p2 }
 0x2bd   : > { %p911_p6 = pnand %p910_p5, %p904_p13 }
 0x2bf   : > { %914 = shalt.err (!%p911_p6)
}
 0x2c0   : > { %776 = dma.vmem_to_hbm [thread:$0]  (%p1065_p3), %s659_s21, 16, %s1187_s8, %s646_s11  }
 0x2c1 PF: > { %p782_p7 = scmp.ge.s32.totalorder %s981_s25, 2  ;;  %s670_s7 = sand.u32 1, %s953_s18  }
 0x2c2   : > { %s671_s12 = scalar_lea.sflag [#allocation4], %s670_s7 }
 0x2c3   : > { %p779_p8 = pnand %p782_p7, %p1075_p9 }
 0x2c5   : > { %948 = dma.done.wait (!%p779_p8), %s671_s12, 16  }
 0x2c6   : > { %950 = vsyncadd (!%p779_p8), %s671_s12, 4294967280  ;;  %s18_s25 = sadd.s32 1, %s981_s25   ;;  %s1245_s18 = smov %s957_s19 }
 0x2c7   : > { %p15_p10 = scmp.ge.s32.totalorder %s18_s25, 6   ;;  %s1246_s19 = smov %s961_s20 }
 0x2c8   : > { %s1247_s20 = smov %s1083_s9  ;;  %s1248_s21 = smov %s973_s23 }
 0x2c9   : > { %s1249_s22 = smov %s977_s24  ;;  %s1250_s23 = smov %s1253_s28 }
 0x2ca   : > { %s1251_s24 = smov %s1257_s29  ;;  %17 = sbr.rel (!%p15_p10) target bundleno = 5 (0x5), region = 83 }
 0x2d1   :  { %675 = vsyncpa [#allocation4], 1 }
 0x2d2   :  { %677 = vsyncpa [#allocation4 + $0x1], 1 }

</bundles_post_ra>
